<compile_context>
chip_gen: v6e
topology: v6e:2x2x1
jax: 0.10.0
libtpu: 0.0.40
codegen_flags: <defaults>
</compile_context>

<pallas_src>
import functools

import jax
import jax.numpy as jnp
from jax.experimental import pallas as pl
from jax.experimental.pallas import tpu as pltpu


def _round_up(x, m):
    return ((x + m - 1) // m) * m


# ---------------------------------------------------------------------------
# Fused 1x1-conv (matmul) + folded-affine + activation
# ---------------------------------------------------------------------------
def _matmul_affine_kernel(x_ref, w_ref, t_ref, o_ref, *, act, alpha):
    acc = jnp.dot(x_ref[...], w_ref[...], preferred_element_type=jnp.float32)
    acc = acc + t_ref[...]                       # bias + BN folded into one affine
    if act == "relu":
        acc = jnp.maximum(acc, 0.0)
    elif act == "prelu":
        acc = jnp.where(acc > 0.0, acc, alpha * acc)
    o_ref[...] = acc.astype(o_ref.dtype)


def matmul_affine(x, w, t, *, act="relu", alpha=0.25, out_dtype=None, tm=512):
    """x: (M, K) -> act((x @ w) + t), bf16 MXU path, f32 epilogue."""
    M, K = x.shape
    Kw, Nout = w.shape
    assert K == Kw
    out_dtype = out_dtype or x.dtype
    tm = min(tm, _round_up(M, 8))
    Mp = _round_up(M, tm)                        # pad rows instead of asserting
    xb = x.astype(jnp.bfloat16)
    if Mp != M:
        xb = jnp.pad(xb, ((0, Mp - M), (0, 0)))
    wb = w.astype(jnp.bfloat16)
    tf = t.reshape(1, Nout).astype(jnp.float32)

    kernel = functools.partial(_matmul_affine_kernel, act=act, alpha=float(alpha))
    out = pl.pallas_call(
        kernel,
        out_shape=jax.ShapeDtypeStruct((Mp, Nout), out_dtype),
        grid=(Mp // tm,),
        in_specs=[
            pl.BlockSpec((tm, K), lambda i: (i, 0)),
            pl.BlockSpec((K, Nout), lambda i: (0, 0)),
            pl.BlockSpec((1, Nout), lambda i: (0, 0)),
        ],
        out_specs=pl.BlockSpec((tm, Nout), lambda i: (i, 0)),
        compiler_params=pltpu.CompilerParams(dimension_semantics=("parallel",)),
    )(xb, wb, tf)
    return out if Mp == M else out[:M]


# ---------------------------------------------------------------------------
# 3x3 (dilated) conv as halo-DMA + 9-tap MXU accumulation (no im2col in HBM)
# ---------------------------------------------------------------------------
def _conv3x3_kernel(xp_ref, w_ref, t_ref, o_ref, halo_ref, dma_sem,
                    *, th, W, We, d, act, alpha):
    n = pl.program_id(0)
    h = pl.program_id(1)
    row0 = h * th
    # One rectangular DMA of the padded row block (with halo) into VMEM.
    cp = pltpu.make_async_copy(
        xp_ref.at[n, pl.ds(row0, th + 2 * d), :, :], halo_ref, dma_sem)
    cp.start()
    cp.wait()

    C = w_ref.shape[1]
    Cout = w_ref.shape[2]
    acc = jnp.zeros((th * We, Cout), jnp.float32)
    for tap in range(9):                          # tap decomposition = K tiling
        ky, kx = divmod(tap, 3)
        win = halo_ref[ky * d:ky * d + th, kx * d:kx * d + We, :]
        acc = acc + jnp.dot(win.reshape(th * We, C), w_ref[tap],
                            preferred_element_type=jnp.float32)
    acc = acc + t_ref[...]                        # folded bias + BN affine
    if act == "relu":
        acc = jnp.maximum(acc, 0.0)
    else:                                         # prelu
        acc = jnp.where(acc > 0.0, acc, alpha * acc)
    acc = acc.reshape(th, We, Cout)[:, :W, :]
    o_ref[...] = acc.astype(o_ref.dtype)


def _pick_th(H, W, C, Cout, d, budget):
    """Largest row tile (divisor of H) whose VMEM footprint fits `budget`."""
    We = _round_up(W, 8)
    best = 1
    for th in range(1, H + 1):
        if H % th:
            continue
        rows = th * We
        est = ((th + 2 * d) * (2 * d + We) * C * 2   # halo block (bf16)
               + 2 * 9 * C * Cout * 2                # weights, double-buffered (bf16)
               + 2 * th * W * Cout * 4               # output blocks, double-buffered
               + rows * Cout * 4                     # f32 accumulator
               + rows * C * 2)                       # one tap window copy (bf16)
        if rows <= 2048 and est <= budget:
            best = th
    return best


def conv3x3_affine(x_nhwc, w9, t, dilation, *, act="relu", alpha=0.25,
                   out_dtype=None, vmem_budget=40 * 2**20):
    """3x3 conv, padding == dilation ('same'), fused affine + activation."""
    N, H, W, C = x_nhwc.shape
    Cout = w9.shape[-1]
    d = int(dilation)
    out_dtype = out_dtype or x_nhwc.dtype
    We = _round_up(W, 8)                 # lane/sublane-friendly window width
    th = _pick_th(H, W, C, Cout, d, vmem_budget)

    xb = x_nhwc.astype(jnp.bfloat16)
    # H padded by d each side; W padded by d left and d + (We - W) right.
    xp = jnp.pad(xb, ((0, 0), (d, d), (d, d + (We - W)), (0, 0)))
    wb = w9.astype(jnp.bfloat16)
    tf = t.reshape(1, Cout).astype(jnp.float32)

    kernel = functools.partial(_conv3x3_kernel, th=th, W=W, We=We, d=d,
                               act=act, alpha=float(alpha))
    return pl.pallas_call(
        kernel,
        out_shape=jax.ShapeDtypeStruct((N, H, W, Cout), out_dtype),
        grid=(N, H // th),
        in_specs=[
            pl.BlockSpec(memory_space=pl.ANY),                   # padded x stays in HBM
            pl.BlockSpec((9, C, Cout), lambda n, h: (0, 0, 0)),   # folded weights (resident)
            pl.BlockSpec((1, Cout), lambda n, h: (0, 0)),         # folded affine
        ],
        out_specs=pl.BlockSpec((None, th, W, Cout), lambda n, h: (n, h, 0, 0)),
        scratch_shapes=[
            pltpu.VMEM((th + 2 * d, 2 * d + We, C), jnp.bfloat16),  # halo block
            pltpu.SemaphoreType.DMA(()),
        ],
        compiler_params=pltpu.CompilerParams(
            dimension_semantics=("parallel", "parallel"),
            vmem_limit_bytes=48 * 1024 * 1024,
        ),
    )(xp, wb, tf)


# ---------------------------------------------------------------------------
# Tiled global average pool (AdaptiveAvgPool2d((1,1)))
# ---------------------------------------------------------------------------
def _gap_kernel(x_ref, o_ref, *, inv_hw):
    @pl.when(pl.program_id(0) == 0)
    def _():
        o_ref[...] = jnp.zeros_like(o_ref)

    o_ref[...] = o_ref[...] + jnp.sum(x_ref[...].astype(jnp.float32), axis=1)

    @pl.when(pl.program_id(0) == pl.num_programs(0) - 1)
    def _():
        o_ref[...] = o_ref[...] * inv_hw


def global_avg_pool(x_nhwc, chunk_target=512):
    N, H, W, C = x_nhwc.shape
    HW = H * W
    chunk = HW
    for c in range(min(HW, chunk_target), 0, -1):
        if HW % c == 0 and (c % 8 == 0 or c == HW):
            chunk = c
            break
    xf = x_nhwc.reshape(N, HW, C)
    kernel = functools.partial(_gap_kernel, inv_hw=1.0 / HW)
    return pl.pallas_call(
        kernel,
        out_shape=jax.ShapeDtypeStruct((N, C), jnp.float32),
        grid=(HW // chunk,),
        in_specs=[pl.BlockSpec((N, chunk, C), lambda i: (0, i, 0))],
        out_specs=pl.BlockSpec((N, C), lambda i: (0, 0)),
        compiler_params=pltpu.CompilerParams(dimension_semantics=("arbitrary",)),
    )(xf)


# ---------------------------------------------------------------------------
# Parameters (weights in matmul layout, bias + inference-BN folded)
# ---------------------------------------------------------------------------
def init_aspp_params(key, in_ch, depth, out_ch, dilations, eps=1e-5):
    std = 0.01                                   # m.weight.data.normal_(0, 0.01)
    ki = iter(jax.random.split(key, 12))

    def bn_fold(w, b, c):
        gamma = jnp.ones((c,), jnp.float32)
        beta = jnp.zeros((c,), jnp.float32)
        mean = jnp.zeros((c,), jnp.float32)
        var = jnp.ones((c,), jnp.float32)
        scale = gamma / jnp.sqrt(var + eps)
        return w * scale, (b - mean) * scale + beta

    def conv1x1(cin, cout):
        w = std * jax.random.normal(next(ki), (cin, cout), jnp.float32)
        b = std * jax.random.normal(next(ki), (cout,), jnp.float32)
        return bn_fold(w, b, cout)

    def conv3x3(cin, cout):                      # (9, cin, cout), tap = ky*3 + kx
        w = std * jax.random.normal(next(ki), (9, cin, cout), jnp.float32)
        b = std * jax.random.normal(next(ki), (cout,), jnp.float32)
        return bn_fold(w, b, cout)

    p = {}
    p["conv_x_w"], p["conv_x_t"] = conv1x1(in_ch, depth)   # self.conv (pooled feats)
    p["conv0_w"], p["conv0_t"] = conv1x1(in_ch, depth)     # self.conv2d_0
    for i in range(1, 4):                                  # self.conv2d_1..3
        p[f"conv{i}_w"], p[f"conv{i}_t"] = conv3x3(in_ch, depth)
    p["bott_w"], p["bott_t"] = conv3x3(5 * depth, out_ch)  # self.bottleneck
    p["prelu_alpha"] = 0.25                                # nn.PReLU() init
    p["dilations"] = list(dilations)
    return p


# ---------------------------------------------------------------------------
# Forward
# ---------------------------------------------------------------------------
def aspp_forward(x_nchw, params):
    x = jnp.transpose(x_nchw, (0, 2, 3, 1)).astype(jnp.bfloat16)   # NHWC, MXU dtype
    N, H, W, C = x.shape
    depth = params["conv_x_w"].shape[-1]

    # image-level branch: avgpool -> 1x1 conv -> BN -> ReLU -> bilinear upsample.
    pooled = global_avg_pool(x)                                    # (N, C) f32
    img = matmul_affine(pooled, params["conv_x_w"], params["conv_x_t"],
                        act="relu", out_dtype=jnp.bfloat16)        # (N, depth)
    # bilinear upsample of a 1x1 map with align_corners=True is a broadcast.
    img = jnp.broadcast_to(img[:, None, None, :], (N, H, W, depth))

    # 1x1 branch
    out0 = matmul_affine(x.reshape(N * H * W, C), params["conv0_w"],
                         params["conv0_t"], act="relu",
                         out_dtype=jnp.bfloat16).reshape(N, H, W, depth)

    branches = [img, out0]
    for i, d in enumerate(params["dilations"], start=1):           # dilated 3x3 branches
        branches.append(conv3x3_affine(x, params[f"conv{i}_w"], params[f"conv{i}_t"],
                                       d, act="relu", out_dtype=jnp.bfloat16))

    # torch.cat([image_features, out_0, out_1, out_2, out_3], 1) in NHWC.
    cat = jnp.concatenate(branches, axis=-1)                       # (N, H, W, 5*depth)

    # bottleneck 3x3 (pad=1) -> BN -> PReLU
    out = conv3x3_affine(cat, params["bott_w"], params["bott_t"], 1,
                         act="prelu", alpha=params["prelu_alpha"],
                         out_dtype=jnp.float32)
    return jnp.transpose(out, (0, 3, 1, 2))                        # back to NCHW


# ---------------------------------------------------------------------------
if __name__ == "__main__":
    key = jax.random.PRNGKey(0)
    k_x, k_p = jax.random.split(key)

    # small stand-ins for the (2048 -> depth) ASPP with 256-ch bottleneck output
    N, Cin, H, W = 2, 32, 16, 16
    depth, out_ch = 16, 32
    dilation_series = [2, 4, 6]        # padding_series == dilation_series (as used)

    x = jax.random.normal(k_x, (N, Cin, H, W), dtype=jnp.float32)
    params = init_aspp_params(k_p, Cin, depth, out_ch, dilation_series)

    y = aspp_forward(x, params)
    jax.block_until_ready(y)
    assert y.shape == (N, out_ch, H, W), y.shape
    assert y.dtype == jnp.float32
    assert bool(jnp.all(jnp.isfinite(y)))
    print("KERNEL_OK")
</pallas_src>

<mosaic_0001>
module attributes {stable_mosaic.version = 11 : i64} {
  func.func @_gap_kernel(%arg0: i32, %arg1: memref<2x256x32xbf16, #tpu.memory_space<vmem>>, %arg2: memref<2x32xf32, #tpu.memory_space<vmem>>) attributes {dimension_semantics = [#tpu.dimension_semantics<arbitrary>], iteration_bounds = array<i64: 1>, scalar_prefetch = 0 : i64, scratch_operands = 0 : i64, tpu.core_type = #tpu.core_type<tc>, window_params = [{transform_indices = @transform_0, window_bounds = array<i64: 2, 256, 32>}, {pipeline_mode = #tpu.pipeline_mode<synchronous>, transform_indices = @transform_1, window_bounds = array<i64: 2, 32>}]} {
    %c0_i32 = arith.constant 0 : i32
    %0 = arith.cmpi eq, %arg0, %c0_i32 : i32
    %1 = arith.extui %0 : i1 to i32
    %c0_i32_0 = arith.constant 0 : i32
    %2 = arith.cmpi ne, %1, %c0_i32_0 : i32
    scf.if %2 {
      %cst_9 = arith.constant 0.000000e+00 : f32
      %12 = vector.broadcast %cst_9 : f32 to vector<2x32xf32>
      %c0_10 = arith.constant 0 : index
      %c0_11 = arith.constant 0 : index
      %13 = vector.load %arg2[%c0_10, %c0_11] : memref<2x32xf32, #tpu.memory_space<vmem>>, vector<2x32xf32>
      tpu.vector_store %arg2[%c0_10, %c0_11], %12 {strides = array<i32>} : memref<2x32xf32, #tpu.memory_space<vmem>>, vector<2x32xf32>,
    } else {
    }
    %c0 = arith.constant 0 : index
    %c0_1 = arith.constant 0 : index
    %3 = vector.load %arg2[%c0, %c0_1] : memref<2x32xf32, #tpu.memory_space<vmem>>, vector<2x32xf32>
    %c0_2 = arith.constant 0 : index
    %c0_3 = arith.constant 0 : index
    %c0_4 = arith.constant 0 : index
    %4 = vector.load %arg1[%c0_2, %c0_3, %c0_4] : memref<2x256x32xbf16, #tpu.memory_space<vmem>>, vector<2x256x32xbf16>
    %5 = arith.extf %4 : vector<2x256x32xbf16> to vector<2x256x32xf32>
    %cst = arith.constant dense<0.000000e+00> : vector<2x32xf32>
    %6 = vector.multi_reduction <add>, %5, %cst [1] : vector<2x256x32xf32> to vector<2x32xf32>
    %7 = arith.addf %3, %6 : vector<2x32xf32>
    %c0_5 = arith.constant 0 : index
    %c0_6 = arith.constant 0 : index
    %8 = vector.load %arg2[%c0_5, %c0_6] : memref<2x32xf32, #tpu.memory_space<vmem>>, vector<2x32xf32>
    tpu.vector_store %arg2[%c0_5, %c0_6], %7 {strides = array<i32>} : memref<2x32xf32, #tpu.memory_space<vmem>>, vector<2x32xf32>,
    %c0_i32_7 = arith.constant 0 : i32
    %9 = arith.cmpi eq, %arg0, %c0_i32_7 : i32
    %10 = arith.extui %9 : i1 to i32
    %c0_i32_8 = arith.constant 0 : i32
    %11 = arith.cmpi ne, %10, %c0_i32_8 : i32
    scf.if %11 {
      %c0_9 = arith.constant 0 : index
      %c0_10 = arith.constant 0 : index
      %12 = vector.load %arg2[%c0_9, %c0_10] : memref<2x32xf32, #tpu.memory_space<vmem>>, vector<2x32xf32>
      %cst_11 = arith.constant 3.906250e-03 : f32
      %13 = vector.broadcast %cst_11 : f32 to vector<2x32xf32>
      %14 = arith.mulf %12, %13 : vector<2x32xf32>
      %c0_12 = arith.constant 0 : index
      %c0_13 = arith.constant 0 : index
      %15 = vector.load %arg2[%c0_12, %c0_13] : memref<2x32xf32, #tpu.memory_space<vmem>>, vector<2x32xf32>
      tpu.vector_store %arg2[%c0_12, %c0_13], %14 {strides = array<i32>} : memref<2x32xf32, #tpu.memory_space<vmem>>, vector<2x32xf32>,
    } else {
    }
    return
  }
  func.func @transform_0(%arg0: i32) -> (i32, i32, i32) {
    %c0_i32 = arith.constant 0 : i32
    %c0_i32_0 = arith.constant 0 : i32
    %c0_i32_1 = arith.constant 0 : i32
    return %c0_i32, %arg0, %c0_i32_0 : i32, i32, i32
  }
  func.func @transform_1(%arg0: i32) -> (i32, i32) {
    %c0_i32 = arith.constant 0 : i32
    %c0_i32_0 = arith.constant 0 : i32
    %c0_i32_1 = arith.constant 0 : i32
    return %c0_i32, %c0_i32_0 : i32, i32
  }
}

</mosaic_0001>

<bundles_post_ra>
// kernel: tpu_custom_call.1
= control target key start
LH: loop header
LB: loop body
LE: loop exit
PB: predicated region body
PF: predicated region fallthrough
CT: control target
= control target key end

     0   :  { %vm13_vm0 = vcmask 254976   ;;  %v494_v0 = vmov 0.0   ;;  %s672_s0 = inlined_call_operand.vmem [shape: bf16[2,256,32], index: 0, kind: input, shape index: {}]   ;;  %s673_s1 = inlined_call_operand.hbm [shape: f32[2,32], index: 1, kind: output, shape index: {}]  }
   0x1   :  { %14 = vst.msk [vmem:[#allocation2] sm:$0x3] %vm13_vm0, %v494_v0  ;;  %v312_v1 = vld [vmem:[%s672_s0] sm:$0xff]   ;;  %v439_v2 = vld [vmem:[%s672_s0 + $0x8] sm:$0xff]  }
   0x2   :  { %6 = vsyncpa [#allocation3], 0  ;;  %v313_v3 = vunpack.c.l.bf16 %v312_v1  ;;  %v314_v4 = vunpack.c.h.bf16 %v312_v1  ;;  %v317_v5 = vunpack.c.l.bf16 %v439_v2  ;;  %v440_v6 = vld [vmem:[%s672_s0 + $0x10] sm:$0xff]   ;;  %vm144_vm1 = vcmask 261120   ;;  %v441_v12 = vld [vmem:[%s672_s0 + $0x18] sm:$0xff]  }
   0x3   :  { %v318_v7 = vunpack.c.h.bf16 %v439_v2  ;;  %v321_v8 = vunpack.c.l.bf16 %v440_v6  ;;  %v322_v14 = vunpack.c.h.bf16 %v440_v6  ;;  %v454_v15 = vld [vmem:[%s672_s0 + $0x80] sm:$0xff]   ;;  %v455_v16 = vld [vmem:[%s672_s0 + $0x88] sm:$0xff]   ;;  %v325_v19 = vunpack.c.l.bf16 %v441_v12  ;;  %v456_v25 = vld [vmem:[%s672_s0 + $0x90] sm:$0xff]  }
   0x4   :  { %v145_v9 = vsel %vm144_vm1, %v313_v3, 0.0  ;;  %v146_v10 = vsel %vm144_vm1, %v314_v4, 0.0  ;;  %v148_v11 = vsel %vm144_vm1, %v317_v5, 0.0  ;;  %v442_v21 = vld [vmem:[%s672_s0 + $0x20] sm:$0xff]   ;;  %v377_v22 = vunpack.c.l.bf16 %v454_v15  ;;  %v443_v34 = vld [vmem:[%s672_s0 + $0x28] sm:$0xff]   ;;  %v457_v40 = vld [vmem:[%s672_s0 + $0x98] sm:$0xff]  }
   0x5   :  { %v147_v13 = vadd.f32 %v146_v10, %v145_v9  ;;  %v150_v17 = vsel %vm144_vm1, %v318_v7, 0.0  ;;  %v152_v20 = vsel %vm144_vm1, %v321_v8, 0.0  ;;  %v378_v23 = vunpack.c.h.bf16 %v454_v15  ;;  %v444_v49 = vld [vmem:[%s672_s0 + $0x30] sm:$0xff]   ;;  %v458_v54 = vld [vmem:[%s672_s0 + $0xa0] sm:$0xff]   ;;  %v445_v63 = vld [vmem:[%s672_s0 + $0x38] sm:$0xff]  }
   0x6   :  { %v381_v24 = vunpack.c.l.bf16 %v455_v16  ;;  %v326_v27 = vunpack.c.h.bf16 %v441_v12  ;;  %v154_v28 = vsel %vm144_vm1, %v322_v14, 0.0  ;;  %v382_v29 = vunpack.c.h.bf16 %v455_v16  ;;  %v459_v4 = vld [vmem:[%s672_s0 + $0xa8] sm:$0xff]  }
   0x7   :  { %v149_v18 = vadd.f32 %v148_v11, %v147_v13  ;;  %v329_v31 = vunpack.c.l.bf16 %v442_v21  ;;  %v385_v32 = vunpack.c.l.bf16 %v456_v25  ;;  %v156_v33 = vsel %vm144_vm1, %v325_v19, 0.0  ;;  %v446_v13 = vld [vmem:[%s672_s0 + $0x40] sm:$0xff]  }
   0x8   :  { %v214_v36 = vsel %vm144_vm1, %v377_v22, 0.0  ;;  %v215_v37 = vsel %vm144_vm1, %v378_v23, 0.0  ;;  %v217_v38 = vsel %vm144_vm1, %v381_v24, 0.0  ;;  %v330_v39 = vunpack.c.h.bf16 %v442_v21 }
   0x9   :  { %v151_v26 = vadd.f32 %v150_v17, %v149_v18  ;;  %v158_v41 = vsel %vm144_vm1, %v326_v27, 0.0  ;;  %v216_v42 = vadd.f32 %v215_v37, %v214_v36  ;;  %v386_v43 = vunpack.c.h.bf16 %v456_v25  ;;  %v460_v18 = vld [vmem:[%s672_s0 + $0xb0] sm:$0xff]   ;;  %v447_v27 = vld [vmem:[%s672_s0 + $0x48] sm:$0xff]  }
   0xa   :  { %v219_v45 = vsel %vm144_vm1, %v382_v29, 0.0  ;;  %v333_v46 = vunpack.c.l.bf16 %v443_v34  ;;  %v160_v47 = vsel %vm144_vm1, %v329_v31, 0.0  ;;  %v389_v50 = vunpack.c.l.bf16 %v457_v40 }
   0xb   :  { %v153_v30 = vadd.f32 %v152_v20, %v151_v26  ;;  %v218_v48 = vadd.f32 %v217_v38, %v216_v42  ;;  %v221_v52 = vsel %vm144_vm1, %v385_v32, 0.0  ;;  %v334_v53 = vunpack.c.h.bf16 %v443_v34  ;;  %v461_v32 = vld [vmem:[%s672_s0 + $0xb8] sm:$0xff]  }
   0xc   :  { %v162_v55 = vsel %vm144_vm1, %v330_v39, 0.0  ;;  %v390_v57 = vunpack.c.h.bf16 %v457_v40  ;;  %v223_v59 = vsel %vm144_vm1, %v386_v43, 0.0  ;;  %v337_v60 = vunpack.c.l.bf16 %v444_v49 }
   0xd   :  { %v155_v35 = vadd.f32 %v154_v28, %v153_v30  ;;  %v220_v56 = vadd.f32 %v219_v45, %v218_v48  ;;  %v164_v61 = vsel %vm144_vm1, %v333_v46, 0.0  ;;  %v393_v0 = vunpack.c.l.bf16 %v458_v54  ;;  %v462_v46 = vld [vmem:[%s672_s0 + $0xc0] sm:$0xff]  }
   0xe   :  { %v225_v2 = vsel %vm144_vm1, %v389_v50, 0.0  ;;  %v338_v3 = vunpack.c.h.bf16 %v444_v49  ;;  %v166_v5 = vsel %vm144_vm1, %v334_v53, 0.0  ;;  %v394_v7 = vunpack.c.h.bf16 %v458_v54 }
   0xf   :  { %v157_v44 = vadd.f32 %v156_v33, %v155_v35  ;;  %v222_v62 = vadd.f32 %v221_v52, %v220_v56  ;;  %v227_v9 = vsel %vm144_vm1, %v390_v57, 0.0  ;;  %v341_v10 = vunpack.c.l.bf16 %v445_v63 }
  0x10   :  { %v168_v11 = vsel %vm144_vm1, %v337_v60, 0.0  ;;  %v397_v14 = vunpack.c.l.bf16 %v459_v4  ;;  %v229_v16 = vsel %vm144_vm1, %v393_v0, 0.0  ;;  %v342_v17 = vunpack.c.h.bf16 %v445_v63  ;;  %v463_v60 = vld [vmem:[%s672_s0 + $0xc8] sm:$0xff]  }
  0x11   :  { %v159_v51 = vadd.f32 %v158_v41, %v157_v44  ;;  %v224_v6 = vadd.f32 %v223_v59, %v222_v62  ;;  %v170_v19 = vsel %vm144_vm1, %v338_v3, 0.0  ;;  %v398_v21 = vunpack.c.h.bf16 %v459_v4  ;;  %v448_v41 = vld [vmem:[%s672_s0 + $0x50] sm:$0xff]  }
  0x12   :  { %v231_v23 = vsel %vm144_vm1, %v394_v7, 0.0  ;;  %v345_v24 = vunpack.c.l.bf16 %v446_v13  ;;  %v172_v25 = vsel %vm144_vm1, %v341_v10, 0.0  ;;  %v401_v28 = vunpack.c.l.bf16 %v460_v18  ;;  %v464_v10 = vld [vmem:[%s672_s0 + $0xd0] sm:$0xff]  }
  0x13   :  { %v161_v58 = vadd.f32 %v160_v47, %v159_v51  ;;  %v226_v12 = vadd.f32 %v225_v2, %v224_v6  ;;  %v233_v30 = vsel %vm144_vm1, %v397_v14, 0.0  ;;  %v346_v31 = vunpack.c.h.bf16 %v446_v13 }
  0x14   :  { %v174_v33 = vsel %vm144_vm1, %v342_v17, 0.0  ;;  %v402_v35 = vunpack.c.h.bf16 %v460_v18  ;;  %v235_v37 = vsel %vm144_vm1, %v398_v21, 0.0  ;;  %v349_v38 = vunpack.c.l.bf16 %v447_v27 }
  0x15   :  { %v163_v1 = vadd.f32 %v162_v55, %v161_v58  ;;  %v228_v20 = vadd.f32 %v227_v9, %v226_v12  ;;  %v176_v39 = vsel %vm144_vm1, %v345_v24, 0.0  ;;  %v405_v42 = vunpack.c.l.bf16 %v461_v32  ;;  %v449_v55 = vld [vmem:[%s672_s0 + $0x58] sm:$0xff]  }
  0x16   :  { %v237_v44 = vsel %vm144_vm1, %v401_v28, 0.0  ;;  %v350_v45 = vunpack.c.h.bf16 %v447_v27  ;;  %v178_v47 = vsel %vm144_vm1, %v346_v31, 0.0  ;;  %v406_v49 = vunpack.c.h.bf16 %v461_v32  ;;  %v465_v24 = vld [vmem:[%s672_s0 + $0xd8] sm:$0xff]  }
  0x17   :  { %v165_v8 = vadd.f32 %v164_v61, %v163_v1  ;;  %v230_v26 = vadd.f32 %v229_v16, %v228_v20  ;;  %v239_v51 = vsel %vm144_vm1, %v402_v35, 0.0  ;;  %v353_v52 = vunpack.c.l.bf16 %v448_v41 }
  0x18   :  { %v180_v53 = vsel %vm144_vm1, %v349_v38, 0.0  ;;  %v409_v56 = vunpack.c.l.bf16 %v462_v46  ;;  %v241_v58 = vsel %vm144_vm1, %v405_v42, 0.0  ;;  %v354_v59 = vunpack.c.h.bf16 %v448_v41  ;;  %v466_v38 = vld [vmem:[%s672_s0 + $0xe0] sm:$0xff]  }
  0x19   :  { %v167_v15 = vadd.f32 %v166_v5, %v165_v8  ;;  %v232_v34 = vadd.f32 %v231_v23, %v230_v26  ;;  %v182_v61 = vsel %vm144_vm1, %v350_v45, 0.0  ;;  %v410_v63 = vunpack.c.h.bf16 %v462_v46  ;;  %v450_v5 = vld [vmem:[%s672_s0 + $0x60] sm:$0xff]  }
  0x1a   :  { %v243_v1 = vsel %vm144_vm1, %v406_v49, 0.0  ;;  %v357_v2 = vunpack.c.l.bf16 %v449_v55  ;;  %v184_v3 = vsel %vm144_vm1, %v353_v52, 0.0  ;;  %v413_v6 = vunpack.c.l.bf16 %v463_v60  ;;  %v467_v52 = vld [vmem:[%s672_s0 + $0xe8] sm:$0xff]  }
  0x1b   :  { %v169_v22 = vadd.f32 %v168_v11, %v167_v15  ;;  %v234_v40 = vadd.f32 %v233_v30, %v232_v34  ;;  %v245_v8 = vsel %vm144_vm1, %v409_v56, 0.0  ;;  %v358_v9 = vunpack.c.h.bf16 %v449_v55 }
  0x1c   :  { %v186_v11 = vsel %vm144_vm1, %v354_v59, 0.0  ;;  %v414_v13 = vunpack.c.h.bf16 %v463_v60  ;;  %v247_v15 = vsel %vm144_vm1, %v410_v63, 0.0  ;;  %v361_v16 = vunpack.c.l.bf16 %v450_v5 }
  0x1d   :  { %v171_v29 = vadd.f32 %v170_v19, %v169_v22  ;;  %v236_v48 = vadd.f32 %v235_v37, %v234_v40  ;;  %v188_v17 = vsel %vm144_vm1, %v357_v2, 0.0  ;;  %v451_v19 = vld [vmem:[%s672_s0 + $0x68] sm:$0xff]   ;;  %v417_v20 = vunpack.c.l.bf16 %v464_v10 }
  0x1e   :  { %v249_v22 = vsel %vm144_vm1, %v413_v6, 0.0  ;;  %v362_v23 = vunpack.c.h.bf16 %v450_v5  ;;  %v418_v27 = vunpack.c.h.bf16 %v464_v10  ;;  %v365_v30 = vunpack.c.l.bf16 %v451_v19 }
  0x1f   :  { %v173_v36 = vadd.f32 %v172_v25, %v171_v29  ;;  %v238_v54 = vadd.f32 %v237_v44, %v236_v48  ;;  %v190_v25 = vsel %vm144_vm1, %v358_v9, 0.0  ;;  %v251_v29 = vsel %vm144_vm1, %v414_v13, 0.0 }
  0x20   :  { %v192_v31 = vsel %vm144_vm1, %v361_v16, 0.0  ;;  %v421_v34 = vunpack.c.l.bf16 %v465_v24  ;;  %v366_v37 = vunpack.c.h.bf16 %v451_v19  ;;  %v422_v41 = vunpack.c.h.bf16 %v465_v24 }
  0x21   :  { %v175_v43 = vadd.f32 %v174_v33, %v173_v36  ;;  %v240_v62 = vadd.f32 %v239_v51, %v238_v54  ;;  %v452_v33 = vld [vmem:[%s672_s0 + $0x70] sm:$0xff]   ;;  %v253_v36 = vsel %vm144_vm1, %v417_v20, 0.0  ;;  %v196_v45 = vsel %vm144_vm1, %v365_v30, 0.0 }
  0x22   :  { %v369_v44 = vunpack.c.l.bf16 %v452_v33  ;;  %v425_v48 = vunpack.c.l.bf16 %v466_v38  ;;  %v370_v51 = vunpack.c.h.bf16 %v452_v33  ;;  %v426_v55 = vunpack.c.h.bf16 %v466_v38 }
  0x23   :  { %v177_v50 = vadd.f32 %v176_v39, %v175_v43  ;;  %v242_v4 = vadd.f32 %v241_v58, %v240_v62  ;;  %v194_v39 = vsel %vm144_vm1, %v362_v23, 0.0  ;;  %v255_v43 = vsel %vm144_vm1, %v418_v27, 0.0 }
  0x24   :  { %v200_v59 = vsel %vm144_vm1, %v369_v44, 0.0  ;;  %v261_v63 = vsel %vm144_vm1, %v425_v48, 0.0  ;;  %v202_v2 = vsel %vm144_vm1, %v370_v51, 0.0  ;;  %v263_v6 = vsel %vm144_vm1, %v426_v55, 0.0 }
  0x25   :  { %v179_v57 = vadd.f32 %v178_v47, %v177_v50  ;;  %v244_v12 = vadd.f32 %v243_v1, %v242_v4  ;;  %v453_v47 = vld [vmem:[%s672_s0 + $0x78] sm:$0xff]   ;;  %v257_v50 = vsel %vm144_vm1, %v421_v34, 0.0  ;;  %v468_v1 = vld [vmem:[%s672_s0 + $0xf0] sm:$0xff]   ;;  %v430_v4 = vunpack.c.h.bf16 %v467_v52 }
  0x26   :  { %v373_v58 = vunpack.c.l.bf16 %v453_v47  ;;  %v433_v9 = vunpack.c.l.bf16 %v468_v1  ;;  %vm285_vm2 = vcmask 1041409  }
  0x27   :  { %v181_v0 = vadd.f32 %v180_v53, %v179_v57  ;;  %v246_v18 = vadd.f32 %v245_v8, %v244_v12  ;;  %v198_v53 = vsel %vm144_vm1, %v366_v37, 0.0  ;;  %v259_v57 = vsel %vm144_vm1, %v422_v41, 0.0  ;;  %v469_v12 = vld [vmem:[%s672_s0 + $0xf8] sm:$0xff]   ;;  %s495_s0 = smov [#allocation2]  }
  0x28   :  { %v437_v19 = vunpack.c.l.bf16 %v469_v12  ;;  %v438_v23 = vunpack.c.h.bf16 %v469_v12  ;;  %s303_s12 = sshll.u32 %s495_s0, 4  ;;  %s304_s12 = int_to_ptr.vmem [resolvable:$true] %s303_s12 }
  0x29   :  { %v183_v7 = vadd.f32 %v182_v61, %v181_v0  ;;  %v248_v26 = vadd.f32 %v247_v15, %v246_v18  ;;  %v429_v61 = vunpack.c.l.bf16 %v467_v52  ;;  %v374_v0 = vunpack.c.h.bf16 %v453_v47  ;;  %s472_s13 = scalar_lea.vmem %s304_s12, 32  ;;  %p477_p1 = scmp.lt.s32.totalorder %s304_s12, %s304_s12 }
  0x2a   :  { %v434_v15 = vunpack.c.h.bf16 %v468_v1  ;;  %v275_v30 = vsel %vm144_vm1, %v438_v23, 0.0  ;;  %p473_p0 = scmp.ne.s32.totalorder %s304_s12, %s472_s13  ;;  %p478_p2 = scmp.lt.s32.totalorder %s472_s13, %s472_s13 }
  0x2b   :  { %v185_v14 = vadd.f32 %v184_v3, %v183_v7  ;;  %v250_v32 = vadd.f32 %v249_v22, %v248_v26  ;;  %v204_v7 = vsel %vm144_vm1, %v373_v58, 0.0  ;;  %v206_v13 = vsel %vm144_vm1, %v374_v0, 0.0 }
  0x2c   :  { %p479_p3 = por %p478_p2, %p477_p1 }
  0x2d   :  { %v187_v21 = vadd.f32 %v186_v11, %v185_v14  ;;  %v252_v40 = vadd.f32 %v251_v29, %v250_v32  ;;  %v265_v11 = vsel %vm144_vm1, %v429_v61, 0.0 }
  0x2e   :  { %p480_p4 = pnand %p479_p3, %p473_p0 }
  0x2f   :  { %v189_v28 = vadd.f32 %v188_v17, %v187_v21  ;;  %v254_v46 = vadd.f32 %v253_v36, %v252_v40  ;;  %v267_v17 = vsel %vm144_vm1, %v430_v4, 0.0  ;;  %v269_v21 = vsel %vm144_vm1, %v433_v9, 0.0 }
  0x31   :  { %v191_v35 = vadd.f32 %v190_v25, %v189_v28  ;;  %v256_v54 = vadd.f32 %v255_v43, %v254_v46  ;;  %v271_v25 = vsel %vm144_vm1, %v434_v15, 0.0  ;;  %v273_v28 = vsel %vm144_vm1, %v437_v19, 0.0 }
  0x33   :  { %v193_v42 = vadd.f32 %v192_v31, %v191_v35  ;;  %v258_v60 = vadd.f32 %v257_v50, %v256_v54 }
  0x35   :  { %v195_v49 = vadd.f32 %v194_v39, %v193_v42  ;;  %v260_v3 = vadd.f32 %v259_v57, %v258_v60  ;;  %v15_v42 = vld [vmem:[#allocation2] sm:$0x3] }
  0x37   :  { %v197_v56 = vadd.f32 %v196_v45, %v195_v49  ;;  %v262_v8 = vadd.f32 %v261_v63, %v260_v3 }
  0x39   :  { %v199_v62 = vadd.f32 %v198_v53, %v197_v56  ;;  %v264_v14 = vadd.f32 %v263_v6, %v262_v8 }
  0x3b   :  { %v201_v5 = vadd.f32 %v200_v59, %v199_v62  ;;  %v266_v18 = vadd.f32 %v265_v11, %v264_v14 }
  0x3d   :  { %v203_v10 = vadd.f32 %v202_v2, %v201_v5  ;;  %v268_v22 = vadd.f32 %v267_v17, %v266_v18 }
  0x3f   :  { %v205_v16 = vadd.f32 %v204_v7, %v203_v10  ;;  %v270_v26 = vadd.f32 %v269_v21, %v268_v22 }
  0x41   :  { %v207_v20 = vadd.f32 %v206_v13, %v205_v16  ;;  %v272_v29 = vadd.f32 %v271_v25, %v270_v26 }
  0x43   :  { %v208_v24 = vrot.slane %v207_v20, 4  ;;  %v274_v32 = vadd.f32 %v273_v28, %v272_v29 }
  0x45   :  { %v209_v27 = vadd.f32 %v208_v24, %v207_v20  ;;  %v276_v33 = vadd.f32 %v275_v30, %v274_v32 }
  0x47   :  { %v210_v31 = vrot.slane %v209_v27, 2  ;;  %v277_v35 = vrot.slane %v276_v33, 4 }
  0x49   :  { %v211_v34 = vadd.f32 %v210_v31, %v209_v27  ;;  %v278_v36 = vadd.f32 %v277_v35, %v276_v33 }
  0x4b   :  { %v212_v37 = vrot.slane %v211_v34, 1  ;;  %v279_v38 = vrot.slane %v278_v36, 2 }
  0x4d   :  { %v280_v39 = vadd.f32 %v279_v38, %v278_v36  ;;  %v213_v40 = vadd.f32 %v212_v37, %v211_v34 }
  0x4f   :  { %v281_v41 = vrot.slane %v280_v39, 1 }
  0x51   :  { %v282_v43 = vadd.f32 %v281_v41, %v280_v39 }
  0x53   :  { %v286_v44 = vsel %vm285_vm2, %v282_v43, %v213_v40 }
  0x54   :  { %v288_v45 = vadd.f32 %v286_v44, %v15_v42 }
  0x56   :  { %290 = vst.msk [vmem:[#allocation2] sm:$0x3] %vm13_vm0, %v288_v45 }
  0x5d   :  { %v294_v46 = vld [vmem:[#allocation2] sm:$0x3] }
  0x5e   :  { %v295_v47 = vmul.f32 0.00390625, %v294_v46 }
  0x60   :  { %296 = vst.msk [vmem:[#allocation2] sm:$0x3] %vm13_vm0, %v295_v47 }
  0x61   :  { %483 = shalt.err (!%p480_p4)
}
  0x62   :  { %306 = dma.vmem_to_hbm [thread:$0]  %s304_s12, 32, %s673_s1, [#allocation3]  }
  0x63   :  { %492 = dma.done.wait [#allocation3], 32  }
  0x64   :  { %493 = vsyncadd [#allocation3], 4294967264 }
  0x65   :  { %310 = vsyncpa [#allocation3], 1 }

</bundles_post_ra>
